<compile_context>
chip_gen: v6e
topology: v6e:2x2x1
jax: 0.10.0
libtpu: 0.0.40
codegen_flags: <defaults>
</compile_context>

<pallas_src>
import math

import numpy as np
import jax
import jax.numpy as jnp
from jax.experimental import pallas as pl
from jax.experimental.pallas import tpu as pltpu


# ----------------------------- Pallas kernels --------------------------------


def _sin_kernel_mxu(idx_ref, e_ref, div_ref, phase_ref, o_ref):
    # idx_ref:   (tm, C)  f32   flattened embedding indices (C indices per row)
    # e_ref:     (C, L)   bf16  0/1 expansion matrix (repeat each index D times)
    # div_ref:   (1, L)   f32   per-lane frequency:  div_term[(lane % D) // 2]
    # phase_ref: (1, L)   f32   per-lane phase: 0.0 (even lane) / pi/2 (odd lane)
    # o_ref:     (tm, L)  f32   lane-dense output slab, L = C * D
    x = idx_ref[...]
    e = e_ref[...]

    # Exact lane-expansion of the f32 indices on the (otherwise idle) MXU:
    # split x into bf16 hi/mid/lo pieces whose sum reconstructs x exactly;
    # each bf16 x {0,1} matmul is exact and accumulation is f32.
    hi = x.astype(jnp.bfloat16)
    r1 = x - hi.astype(jnp.float32)
    mid = r1.astype(jnp.bfloat16)
    lo = (r1 - mid.astype(jnp.float32)).astype(jnp.bfloat16)

    xe = jnp.dot(hi, e, preferred_element_type=jnp.float32)
    xe = xe + jnp.dot(mid, e, preferred_element_type=jnp.float32)
    xe = xe + jnp.dot(lo, e, preferred_element_type=jnp.float32)   # (tm, L)

    # Single transcendental per element: cos(x) == sin(x + pi/2).
    o_ref[...] = jnp.sin(xe * div_ref[...] + phase_ref[...]).astype(o_ref.dtype)


def _sin_kernel_bcast(idx_ref, div_ref, phase_ref, o_ref):
    # C == 1 path (D % 128 == 0): lane-broadcast the index column directly.
    # idx_ref: (tm, 1) f32, div_ref/phase_ref: (1, L) f32, o_ref: (tm, L) f32.
    x = idx_ref[...]
    o_ref[...] = jnp.sin(x * div_ref[...] + phase_ref[...]).astype(o_ref.dtype)


# ------------------------------ wrapper ---------------------------------------


def sinusoidal_positional_embedding(emb_indices, d_model):
    if d_model % 2 != 0:
        raise ValueError(f"Sinusoidal positional encoding with odd d_model: {d_model}")
    D = d_model
    in_shape = emb_indices.shape
    flat = jnp.asarray(emb_indices, jnp.float32).reshape(-1)
    M = int(flat.shape[0])
    if M == 0:
        return jnp.zeros((*in_shape, D), jnp.float32)

    # Lane width of the output slab: smallest multiple of both 128 and D.
    L = (D * 128) // math.gcd(D, 128)
    C = L // D                          # indices packed per output row (1..64)

    # Host-side per-lane constants.
    div_term = jnp.exp(jnp.arange(0, D, 2, dtype=jnp.float32)
                       * (-np.log(10000.0) / D))
    div_lanes = jnp.tile(jnp.repeat(div_term, 2), C).reshape(1, L)            # (1, L)
    phase_lanes = jnp.tile(
        jnp.where(jnp.arange(D) % 2 == 0,
                  jnp.float32(0.0), jnp.float32(np.pi / 2.0)), C).reshape(1, L)

    # Row count (minimal padding: at most C-1 wasted indices).
    n_rows = -(-M // C)

    # Row tiling: ~6 MiB output tiles (amortize per-step overhead, esp. v7x),
    # 8-row granularity, and >= 2 grid steps for mid/large inputs so the two
    # v7x TensorCores both get work.  Tiny inputs use one full-extent block.
    tm_cap = max(8, ((6 << 20) // (L * 4)) // 8 * 8)
    if n_rows >= 16:
        tm = max(8, min(tm_cap, (n_rows // 2) // 8 * 8))
    else:
        tm = n_rows                      # single block == full first dim
    grid = -(-n_rows // tm)              # Pallas masks the partial last block

    m_pad = n_rows * C
    if m_pad != M:
        flat = jnp.pad(flat, (0, m_pad - M))
    idx2d = flat.reshape(n_rows, C)

    # VMEM budget: double-buffered in/out blocks (input lane dim pads to 128
    # in VMEM), ~2 tile-sized in-kernel temporaries (matmul accumulator +
    # elementwise chain), plus the constants.  Cap well under v7x's 64 MiB.
    bytes_in_blk = tm * 128 * 4
    bytes_out_blk = tm * L * 4
    bytes_consts = 2 * L * 4 + (C * L * 2 if C > 1 else 0)
    vmem_need = 2 * bytes_in_blk + 2 * bytes_out_blk + 2 * bytes_out_blk + bytes_consts
    vmem_limit = int(min(40 << 20, max(vmem_need + (2 << 20), 8 << 20)))

    if C > 1:
        expand = (jnp.arange(L)[None, :] // D
                  == jnp.arange(C)[:, None]).astype(jnp.bfloat16)            # (C, L)
        kernel = _sin_kernel_mxu
        operands = (idx2d, expand, div_lanes, phase_lanes)
        in_specs = [
            pl.BlockSpec((tm, C), lambda i: (i, 0)),
            pl.BlockSpec((C, L), lambda i: (0, 0)),
            pl.BlockSpec((1, L), lambda i: (0, 0)),
            pl.BlockSpec((1, L), lambda i: (0, 0)),
        ]
    else:
        kernel = _sin_kernel_bcast
        operands = (idx2d, div_lanes, phase_lanes)
        in_specs = [
            pl.BlockSpec((tm, 1), lambda i: (i, 0)),
            pl.BlockSpec((1, L), lambda i: (0, 0)),
            pl.BlockSpec((1, L), lambda i: (0, 0)),
        ]

    out = pl.pallas_call(
        kernel,
        out_shape=jax.ShapeDtypeStruct((n_rows, L), jnp.float32),
        grid_spec=pltpu.PrefetchScalarGridSpec(
            num_scalar_prefetch=0,
            grid=(grid,),
            in_specs=in_specs,
            out_specs=pl.BlockSpec((tm, L), lambda i: (i, 0)),
        ),
        compiler_params=pltpu.CompilerParams(
            dimension_semantics=("parallel",),
            vmem_limit_bytes=vmem_limit),
    )(*operands)

    # (n_rows, L) slab is memory-layout-identical to (m_pad, D).
    if m_pad == M:
        return out.reshape(*in_shape, D)
    return out.reshape(m_pad, D)[:M].reshape(*in_shape, D)


# --------------------------- pure-JAX reference -------------------------------


def reference_forward(emb_indices, d_model):
    div_term = jnp.exp(jnp.arange(0, d_model, 2, dtype=jnp.float32)
                       * (-np.log(10000.0) / d_model))
    om = jnp.asarray(emb_indices, jnp.float32)[..., None] * div_term     # (..., D/2)
    emb = jnp.stack([jnp.sin(om), jnp.cos(om)], axis=-1)                 # (..., D/2, 2)
    return emb.reshape(*emb_indices.shape, d_model)


# ----------------------------------- main --------------------------------------


if __name__ == "__main__":
    key = jax.random.PRNGKey(0)

    # Primary SMALL example: (batch=2, seq=8, seq=16) positional / distance
    # indices with d_model=32 (exercises the MXU lane-expansion path, C=4).
    d_model = 32
    emb_indices = jax.random.uniform(key, (2, 8, 16), jnp.float32,
                                     minval=0.0, maxval=50.0)
    out = jax.block_until_ready(
        sinusoidal_positional_embedding(emb_indices, d_model))
    assert out.shape == (2, 8, 16, d_model)
    ref = reference_forward(emb_indices, d_model)
    err = float(jnp.max(jnp.abs(out - ref)))
    if not np.isfinite(err) or err > 1e-3:
        raise AssertionError(f"mismatch vs reference (D=32): max abs err = {err}")

    # Also exercise (a) the C == 1 lane-broadcast path (D % 128 == 0) and
    # (b) a ragged size that needs padding + the tail slice.
    for shape, dm in (((2, 8, 16), 128), ((3, 7), 32)):
        xi = jax.random.uniform(jax.random.PRNGKey(1), shape, jnp.float32,
                                minval=0.0, maxval=50.0)
        o = jax.block_until_ready(sinusoidal_positional_embedding(xi, dm))
        assert o.shape == (*shape, dm)
        r = reference_forward(xi, dm)
        e = float(jnp.max(jnp.abs(o - r)))
        if not np.isfinite(e) or e > 1e-3:
            raise AssertionError(f"mismatch vs reference (D={dm}): max abs err = {e}")

    print("KERNEL_OK")
</pallas_src>

<mosaic_0001>
module attributes {stable_mosaic.version = 11 : i64} {
  func.func @_sin_kernel_mxu(%arg0: i32, %arg1: memref<32x4xf32, #tpu.memory_space<vmem>>, %arg2: memref<4x128xbf16, #tpu.memory_space<vmem>>, %arg3: memref<1x128xf32, #tpu.memory_space<vmem>>, %arg4: memref<1x128xf32, #tpu.memory_space<vmem>>, %arg5: memref<32x128xf32, #tpu.memory_space<vmem>>) attributes {dimension_semantics = [#tpu.dimension_semantics<parallel>], iteration_bounds = array<i64: 2>, scalar_prefetch = 0 : i64, scratch_operands = 0 : i64, tpu.core_type = #tpu.core_type<tc>, window_params = [{transform_indices = @transform_0, window_bounds = array<i64: 32, 4>}, {pipeline_mode = #tpu.pipeline_mode<synchronous>, transform_indices = @transform_1, window_bounds = array<i64: 4, 128>}, {pipeline_mode = #tpu.pipeline_mode<synchronous>, transform_indices = @transform_2, window_bounds = array<i64: 1, 128>}, {pipeline_mode = #tpu.pipeline_mode<synchronous>, transform_indices = @transform_3, window_bounds = array<i64: 1, 128>}, {transform_indices = @transform_4, window_bounds = array<i64: 32, 128>}]} {
    %c0 = arith.constant 0 : index
    %c0_0 = arith.constant 0 : index
    %0 = vector.load %arg1[%c0, %c0_0] : memref<32x4xf32, #tpu.memory_space<vmem>>, vector<32x4xf32>
    %c0_1 = arith.constant 0 : index
    %c0_2 = arith.constant 0 : index
    %1 = vector.load %arg2[%c0_1, %c0_2] : memref<4x128xbf16, #tpu.memory_space<vmem>>, vector<4x128xbf16>
    %2 = arith.truncf %0 : vector<32x4xf32> to vector<32x4xbf16>
    %3 = arith.extf %2 : vector<32x4xbf16> to vector<32x4xf32>
    %4 = arith.subf %0, %3 : vector<32x4xf32>
    %5 = arith.truncf %4 : vector<32x4xf32> to vector<32x4xbf16>
    %6 = arith.extf %5 : vector<32x4xbf16> to vector<32x4xf32>
    %7 = arith.subf %4, %6 : vector<32x4xf32>
    %8 = arith.truncf %7 : vector<32x4xf32> to vector<32x4xbf16>
    %cst = arith.constant dense<0.000000e+00> : vector<32x128xf32>
    %9 = tpu.matmul %2, %1, %cst {dimension_numbers = #tpu.dot_dimension_numbers<[1], [0], [0], [1], [0, 0, 1, 1], [], []>} : vector<32x4xbf16>, vector<4x128xbf16>, vector<32x128xf32> -> vector<32x128xf32>
    %cst_3 = arith.constant dense<0.000000e+00> : vector<32x128xf32>
    %10 = tpu.matmul %5, %1, %cst_3 {dimension_numbers = #tpu.dot_dimension_numbers<[1], [0], [0], [1], [0, 0, 1, 1], [], []>} : vector<32x4xbf16>, vector<4x128xbf16>, vector<32x128xf32> -> vector<32x128xf32>
    %11 = arith.addf %9, %10 : vector<32x128xf32>
    %cst_4 = arith.constant dense<0.000000e+00> : vector<32x128xf32>
    %12 = tpu.matmul %8, %1, %cst_4 {dimension_numbers = #tpu.dot_dimension_numbers<[1], [0], [0], [1], [0, 0, 1, 1], [], []>} : vector<32x4xbf16>, vector<4x128xbf16>, vector<32x128xf32> -> vector<32x128xf32>
    %13 = arith.addf %11, %12 : vector<32x128xf32>
    %c0_5 = arith.constant 0 : index
    %c0_6 = arith.constant 0 : index
    %14 = vector.load %arg3[%c0_5, %c0_6] : memref<1x128xf32, #tpu.memory_space<vmem>>, vector<1x128xf32>
    %15 = vector.broadcast %14 : vector<1x128xf32> to vector<32x128xf32>
    %16 = arith.mulf %13, %15 : vector<32x128xf32>
    %c0_7 = arith.constant 0 : index
    %c0_8 = arith.constant 0 : index
    %17 = vector.load %arg4[%c0_7, %c0_8] : memref<1x128xf32, #tpu.memory_space<vmem>>, vector<1x128xf32>
    %18 = vector.broadcast %17 : vector<1x128xf32> to vector<32x128xf32>
    %19 = arith.addf %16, %18 : vector<32x128xf32>
    %20 = math.sin %19 : vector<32x128xf32>
    %c0_9 = arith.constant 0 : index
    %c0_10 = arith.constant 0 : index
    %21 = vector.load %arg5[%c0_9, %c0_10] : memref<32x128xf32, #tpu.memory_space<vmem>>, vector<32x128xf32>
    tpu.vector_store %arg5[%c0_9, %c0_10], %20 {strides = array<i32>} : memref<32x128xf32, #tpu.memory_space<vmem>>, vector<32x128xf32>,
    return
  }
  func.func @transform_0(%arg0: i32) -> (i32, i32) {
    %c0_i32 = arith.constant 0 : i32
    %c0_i32_0 = arith.constant 0 : i32
    return %arg0, %c0_i32 : i32, i32
  }
  func.func @transform_1(%arg0: i32) -> (i32, i32) {
    %c0_i32 = arith.constant 0 : i32
    %c0_i32_0 = arith.constant 0 : i32
    %c0_i32_1 = arith.constant 0 : i32
    return %c0_i32, %c0_i32_0 : i32, i32
  }
  func.func @transform_2(%arg0: i32) -> (i32, i32) {
    %c0_i32 = arith.constant 0 : i32
    %c0_i32_0 = arith.constant 0 : i32
    %c0_i32_1 = arith.constant 0 : i32
    return %c0_i32, %c0_i32_0 : i32, i32
  }
  func.func @transform_3(%arg0: i32) -> (i32, i32) {
    %c0_i32 = arith.constant 0 : i32
    %c0_i32_0 = arith.constant 0 : i32
    %c0_i32_1 = arith.constant 0 : i32
    return %c0_i32, %c0_i32_0 : i32, i32
  }
  func.func @transform_4(%arg0: i32) -> (i32, i32) {
    %c0_i32 = arith.constant 0 : i32
    %c0_i32_0 = arith.constant 0 : i32
    return %arg0, %c0_i32 : i32, i32
  }
}

</mosaic_0001>

<bundles_post_ra>
// kernel: tpu_custom_call.1
= control target key start
LH: loop header
LB: loop body
LE: loop exit
PB: predicated region body
PF: predicated region fallthrough
CT: control target
= control target key end

     0   :  { %9 = vsyncpa [#allocation3], 0  ;;  %s1561_s0 = inlined_call_operand.vmem [shape: f32[64,4], index: 0, kind: input, shape index: {}]   ;;  %s1562_s1 = inlined_call_operand.vmem [shape: bf16[4,128], index: 1, kind: input, shape index: {}]   ;;  %s1563_s2 = inlined_call_operand.vmem [shape: f32[1,128], index: 2, kind: input, shape index: {}]   ;;  %s1564_s3 = inlined_call_operand.vmem [shape: f32[1,128], index: 3, kind: input, shape index: {}]   ;;  %s1565_s4 = inlined_call_operand.hbm [shape: f32[64,128], index: 4, kind: output, shape index: {}]  }
   0x1   :  { %11 = vsyncpa [#allocation3 + $0x1], 0  ;;  %s1161_s15 = smov 0   ;;  %s1163_s16 = smov 0  }
   0x2   :  { %s1165_s17 = smov 0   ;;  %s1167_s18 = smov 0  }
   0x3 LB: > { %s1182_s19 = sadd.s32 4294967295, %s1125_s18   ;;  %s919_s20 = sadd.s32 4294967294, %s1125_s18   ;;  %s1125_s18 = sphi %s1167_s18, %s1575_s18   ;;  %s1121_s17 = sphi %s1165_s17, %s1574_s17   ;;  %s1117_s16 = sphi %s1163_s16, %s1573_s16   ;;  %s1113_s15 = sphi %s1161_s15, %s1572_s15  }
   0x4   : > { %s1186_s21 = sadd.s32 1, %s1125_s18   ;;  %s113_s22 = sadd.s32 1, %s1121_s17 }
   0x5   : > { %s110_s23 = ssub.s32 %s1125_s18, %s1186_s21  ;;  %p123_p0 = scmp.ne.s32.totalorder %s1121_s17, %s1117_s16 }
   0x6   : > { %p111_p1 = scmp.eq.s32.totalorder %s110_s23, 0  ;;  %p124_p2 = scmp.eq.s32.totalorder %s1182_s19, 1 }
   0x7   : > { %p129_p3 = scmp.ne.s32.totalorder %s1117_s16, %s1113_s15  ;;  %p130_p4 = scmp.eq.s32.totalorder %s919_s20, 1 }
   0x8   : > { %s1197_s24 = scalar_select %p111_p1, %s1121_s17, %s113_s22  }
   0x9   : > { %p1199_p5 = por %p124_p2, %p123_p0  ;;  %p1203_p6 = por %p130_p4, %p129_p3 }
   0xa   : > { %p922_p7 = scmp.ge.s32.totalorder %s1125_s18, 1  ;;  %p166_p8 = scmp.lt.s32.totalorder %s1125_s18, 3 }
   0xc   : > { %p167_p9 = pnand %p922_p7, %p166_p8 }
   0xd   : > { %s924_s29 = sshll.u32 (!%p167_p9), %s1182_s19, 2  ;;  %s189_s12 = sand.u32 (!%p167_p9), 1, %s1117_s16  }
   0xe   : > { %170 = sbr.rel (%p167_p9) target bundleno = 393 (0x189), region = 36  ;;  %p193_p10 = scmp.lt.s32.totalorder (!%p167_p9), %s924_s29, 7 }
   0xf   : > { %s923_s13 = sshll.u32 (!%p167_p9), %s189_s12, 5  ;;  %s955_s20 = sshll.u32 (!%p167_p9), %s1182_s19, 9 }
  0x10   : > { %s1486_s14 = scalar_lea.vmem (!%p167_p9), [#allocation2], %s923_s13  ;;  %s1513_s28 = scalar_lea.hbm (!%p167_p9), %s1565_s4, %s955_s20 }
  0x11   : > { %s857_s22 = sshll.u32 (!%p167_p9), %s1486_s14, 4  ;;  %s1521_s19 = scalar_lea.sflag (!%p167_p9), [#allocation3], %s189_s12  ;;  %s1515_s22 = int_to_ptr.vmem [resolvable:$true] %s857_s22 }
  0x13   : > { %v204_v0 = vld [vmem:[%s1562_s1] sm:$0x3]  ;;  %vm234_vm0 = vcmask 1041408   ;;  %s1577_s29 = smov (!%p193_p10, %s924_s29), 7  ;;  %vm227_vm1 = vcmask 31744  }
  0x14   : > { %983 = vmatprep.subr.msk.bf16.mxu0 %vm234_vm0, %v204_v0  ;;  %v236_v1 = vsel %vm234_vm0, %v204_v0, 0  ;;  %984 = vmatprep.subr.msk.bf16.mxu1 %vm234_vm0, %v204_v0  ;;  %s925_s30 = sshll.u32 %s1577_s29, 3  ;;  %v932_v37 = vld [vmem:[%s1563_s2] ss:$0 sm:$0xff]  ;;  %s1065_s29 = scalar_lea.vmem %s1515_s22, 512 }
  0x15   : > { %966 = vmatpush3.bf16.msra.mxu0 %v236_v1  ;;  %972 = vmatpush3.bf16.msra.mxu1 %v236_v1  ;;  %s196_s7 = scalar_lea.vmem %s1561_s0, %s925_s30  ;;  %v1228_v40 = vld [vmem:[%s1564_s3] ss:$0 sm:$0xff]  ;;  %p1066_p11 = scmp.ne.s32.totalorder %s1515_s22, %s1065_s29 }
  0x16   : > { %985 = vmatprep.subr.msk.bf16.mxu0 %vm234_vm0, %v204_v0  ;;  %v200_v2 = vld [vmem:[%s196_s7] sm:$0xff]  ;;  %v201_v3 = vld [vmem:[%s196_s7 + $0x8] sm:$0xff]  ;;  %v202_v4 = vld [vmem:[%s196_s7 + $0x10] sm:$0xff]  ;;  %s1133_s30 = smov [#allocation2]  }
  0x17   : > { %v205_v5 = vpack.c.bf16 %v201_v3, %v200_v2  ;;  %v203_v6 = vld [vmem:[%s196_s7 + $0x18] sm:$0xff]  ;;  %p1067_p12 = pnand %p1066_p11, %p1199_p5  ;;  %s1069_s5 = sshll.u32 %s1133_s30, 4  ;;  %s1070_s5 = int_to_ptr.vmem [resolvable:$false] %s1069_s5 }
  0x18   : > { %v206_v7 = vpack.c.bf16 %v203_v6, %v202_v4  ;;  %s1071_s6 = scalar_lea.vmem %s1070_s5, 1024  ;;  %p1072_p0 = scmp.lt.s32.totalorder %s1515_s22, %s1070_s5 }
  0x19   : > { %v207_v8 = vunpack.c.l.bf16 %v205_v5  ;;  %v208_v9 = vunpack.c.h.bf16 %v205_v5  ;;  %973 = vmatprep.mubr.msk.bf16.mxu1 %vm227_vm1, %v205_v5  ;;  %p1068_p13 = pneg %p1067_p12  ;;  %p1073_p1 = scmp.lt.s32.totalorder %s1071_s6, %s1065_s29 }
  0x1a   : > { %v209_v10 = vunpack.c.l.bf16 %v206_v7  ;;  %v210_v11 = vunpack.c.h.bf16 %v206_v7  ;;  %974 = vmatmul.mubr.msk.bf16.vlgmr.msra.gmra.mxu1 %vm227_vm1, %v206_v7 }
  0x1b   : > { %v211_v12 = vsub.f32 %v200_v2, %v207_v8  ;;  %v212_v13 = vsub.f32 %v201_v3, %v208_v9  ;;  %p1074_p2 = por %p1073_p1, %p1072_p0 }
  0x1c   : > { %v213_v14 = vsub.f32 %v202_v4, %v209_v10  ;;  %v214_v15 = vsub.f32 %v203_v6, %v210_v11 }
  0x1d   : > { %v215_v16 = vpack.c.bf16 %v212_v13, %v211_v12  ;;  %p1075_p3 = pnand %p1074_p2, %p1068_p13 }
  0x1e   : > { %v216_v17 = vpack.c.bf16 %v214_v15, %v213_v14 }
  0x1f   : > { %v217_v18 = vunpack.c.l.bf16 %v215_v16  ;;  %v218_v19 = vunpack.c.h.bf16 %v215_v16  ;;  %967 = vmatprep.mubr.msk.bf16.mxu0 %vm227_vm1, %v215_v16 }
  0x20   : > { %v219_v20 = vunpack.c.l.bf16 %v216_v17  ;;  %v220_v21 = vunpack.c.h.bf16 %v216_v17  ;;  %968 = vmatmul.mubr.msk.bf16.vlgmr.msra.gmra.mxu0 %vm227_vm1, %v216_v17  ;;  %v1128_v17 = vmov 2475754826  }
  0x21   : > { %v221_v22 = vsub.f32 %v211_v12, %v217_v18  ;;  %v222_v23 = vsub.f32 %v212_v13, %v218_v19  ;;  %978 = vmatpush3.bf16.msra.mxu0 %v236_v1  ;;  %v1129_v19 = vmov 2131351028  }
  0x22   : > { %v223_v24 = vsub.f32 %v213_v14, %v219_v20  ;;  %v224_v25 = vsub.f32 %v214_v15, %v220_v21  ;;  %v1127_v15 = vmov 683565275   ;;  %v1130_v21 = vmov 2102212464  }
  0x23   : > { %v225_v26 = vpack.c.bf16 %v222_v23, %v221_v22  ;;  %v1131_v23 = vmov 920167782  }
  0x24   : > { %v226_v27 = vpack.c.bf16 %v224_v25, %v223_v24 }
  0x25   : > { %979 = vmatprep.mubr.msk.bf16.mxu0 %vm227_vm1, %v225_v26 }
  0x28   : > { %980 = vmatmul.mubr.msk.bf16.vlgmr.msra.gmra.mxu0 %vm227_vm1, %v226_v27 }
  0xda   : > { %v975_v29 = vpop.f32.mrf.mxu1 }
  0xdc   : > { %v327_v31 = vpop.f32.mrf.mxu1 }
  0xde   : > { %v976_v35 = vpop.f32.mrf.mxu1 }
  0xe0   : > { %v969_v28 = vpop.f32.mrf.mxu0  ;;  %v330_v51 = vpop.f32.mrf.mxu1 }
  0xe1   : > { %v336_v34 = vadd.f32 %v975_v29, %v969_v28 }
  0xe2   : > { %v272_v30 = vpop.f32.mrf.mxu0 }
  0xe3   : > { %v328_v38 = vadd.f32 %v327_v31, %v272_v30  ;;  %v1132_v30 = vmov 1326507024  }
  0xe4   : > { %v970_v32 = vpop.f32.mrf.mxu0 }
  0xe5   : > { %v339_v42 = vadd.f32 %v976_v35, %v970_v32 }
  0xe6   : > { %v275_v33 = vpop.f32.mrf.mxu0 }
  0xe7   : > { %v331_v59 = vadd.f32 %v330_v51, %v275_v33 }
  0xe8   : > { %v981_v36 = vpop.f32.mrf.mxu0 }
  0xe9   : > { %v399_v39 = vadd.f32 %v981_v36, %v336_v34 }
  0xea   : > { %v382_v41 = vpop.f32.mrf.mxu0 }
  0xeb   : > { %v410_v43 = vmul.f32 %v932_v37, %v399_v39  ;;  %v397_v44 = vadd.f32 %v382_v41, %v328_v38 }
  0xec   : > { %v982_v45 = vpop.f32.mrf.mxu0 }
  0xed   : > { %v1231_v46 = vadd.f32 %v1228_v40, %v410_v43  ;;  %v408_v47 = vmul.f32 %v932_v37, %v397_v44  ;;  %v400_v48 = vadd.f32 %v982_v45, %v339_v42 }
  0xee   : > { %v385_v58 = vpop.f32.mrf.mxu0 }
  0xef   : > { %v631_v49 = vand.u32 2147483647, %v1231_v46  ;;  %v634_v50 = vand.u32 2139095040, %v1231_v46  ;;  %v1236_v52 = vadd.f32 %v1228_v40, %v408_v47  ;;  %v411_v53 = vmul.f32 %v932_v37, %v400_v48 }
  0xf0   : > { %v398_v1 = vadd.f32 %v385_v58, %v331_v59 }
  0xf1   : > { %v635_v54 = vshrl.u32 %v634_v50, 23  ;;  %v638_v55 = vand.u32 8388607, %v631_v49  ;;  %v423_v56 = vand.u32 2147483647, %v1236_v52  ;;  %v426_v57 = vand.u32 2139095040, %v1236_v52 }
  0xf2   : > { %v1243_v61 = vadd.f32 %v1228_v40, %v411_v53  ;;  %v1252_v13 = vmul.f32 %v932_v37, %v398_v1 }
  0xf3   : > { %v942_v60 = vadd.s32 4294967169, %v635_v54  ;;  %v427_v62 = vshrl.u32 %v426_v57, 23  ;;  %v430_v63 = vand.u32 8388607, %v423_v56  ;;  %v639_v2 = vor.u32 8388608, %v638_v55 }
  0xf4   : > { %v738_v5 = vand.u32 2139095040, %v1243_v61 }
  0xf5   : > { %v641_v0 = vadd.s32 1, %v942_v60  ;;  %v934_v3 = vadd.s32 4294967169, %v427_v62  ;;  %v431_v4 = vor.u32 8388608, %v430_v63  ;;  %v1248_v10 = vshll.u32 %v639_v2, 8 }
  0xf6   : > { %v739_v12 = vshrl.u32 %v738_v5, 23 }
  0xf7   : > { %vm642_vm2 = vcmp.gt.s32.totalorder %v641_v0, 0  ;;  %v433_v7 = vadd.s32 1, %v934_v3  ;;  %v1250_v11 = vshll.u32 %v431_v4, 8 }
  0xf8   : > { %v643_v6 = vsel %vm642_vm2, %v641_v0, 0  ;;  %v946_v54 = vadd.s32 4294967169, %v739_v12 }
  0xf9   : > { %v644_v8 = vshrl.u32 %v643_v6, 5  ;;  %v645_v9 = vand.u32 31, %v643_v6  ;;  %vm434_vm3 = vcmp.gt.s32.totalorder %v433_v7, 0 }
  0xfa   : > { %v435_v35 = vsel %vm434_vm3, %v433_v7, 0 }
  0xfb   : > { %v646_v14 = vsub.s32 32, %v645_v9  ;;  %v648_v16 = vshll.u32 %v1127_v15, %v645_v9  ;;  %v651_v18 = vshll.u32 %v1128_v17, %v645_v9  ;;  %v654_v20 = vshll.u32 %v1129_v19, %v645_v9 }
  0xfc   : > { %v657_v22 = vshll.u32 %v1130_v21, %v645_v9  ;;  %v660_v24 = vshll.u32 %v1131_v23, %v645_v9  ;;  %vm663_vm4 = vcmp.lt.s32.totalorder %v644_v8, 1  ;;  %vm664_vm5 = vcmp.lt.s32.totalorder %v644_v8, 2 }
  0xfd   : > { %v649_v25 = vshrl.u32 %v1128_v17, %v646_v14  ;;  %v652_v26 = vshrl.u32 %v1129_v19, %v646_v14  ;;  %v655_v27 = vshrl.u32 %v1130_v21, %v646_v14  ;;  %v647_v28 = vshrl.u32 %v1127_v15, %v646_v14 }
  0xfe   : > { %v658_v29 = vshrl.u32 %v1131_v23, %v646_v14  ;;  %v661_v31 = vshrl.u32 %v1132_v30, %v646_v14  ;;  %vm665_vm6 = vcmp.lt.s32.totalorder %v644_v8, 3  ;;  %vm666_vm7 = vcmp.lt.s32.totalorder %v644_v8, 4 }
  0xff   : > { %v650_v32 = vor.u32 %v649_v25, %v648_v16  ;;  %v653_v33 = vor.u32 %v652_v26, %v651_v18  ;;  %v656_v34 = vor.u32 %v655_v27, %v654_v20  ;;  %v437_v38 = vand.u32 31, %v435_v35 }
 0x100   : > { %v659_v36 = vor.u32 %v658_v29, %v657_v22  ;;  %v662_v37 = vor.u32 %v661_v31, %v660_v24  ;;  %v436_v58 = vshrl.u32 %v435_v35, 5  ;;  %v745_v35 = vadd.s32 1, %v946_v54 }
 0x101   : > { %v667_v39 = vsel %vm663_vm4, %v647_v28, %v650_v32  ;;  %v668_v41 = vsel %vm666_vm7, %v656_v34, 2102212464  ;;  %v671_v42 = vsel %vm663_vm4, %v650_v32, %v653_v33  ;;  %v675_v43 = vsel %vm663_vm4, %v653_v33, %v656_v34 }
 0x102   : > { %v669_v44 = vsel %vm665_vm6, %v653_v33, %v668_v41  ;;  %v672_v45 = vsel %vm666_vm7, %v659_v36, 920167782  ;;  %v676_v47 = vsel %vm666_vm7, %v662_v37, 1326507024  ;;  %v438_v48 = vsub.s32 32, %v437_v38 }
 0x103   : > { %v670_v50 = vsel %vm664_vm5, %v667_v39, %v669_v44  ;;  %v673_v51 = vsel %vm665_vm6, %v656_v34, %v672_v45  ;;  %v677_v53 = vsel %vm665_vm6, %v659_v36, %v676_v47  ;;  %v440_v59 = vshll.u32 %v1127_v15, %v437_v38 }
 0x104   : > { %v674_v55 = vsel %vm664_vm5, %v671_v42, %v673_v51  ;;  %v678_v57 = vsel %vm664_vm5, %v675_v43, %v677_v53  ;;  %v686_v1 = vmul.u32 %v1248_v10, %v670_v50  ;;  %v441_v2 = vshrl.u32 %v1128_v17, %v438_v48 }
 0x105   : > { %v1277_v60 = vmul.u32.u64.low %v1248_v10, %v678_v57  ;;  %v1278_v62 = vmul.u32.u64.high %v1248_v10, %v678_v57, %v1277_v60  ;;  %v1281_v63 = vmul.u32.u64.low %v1248_v10, %v674_v55  ;;  %v1282_v0 = vmul.u32.u64.high %v1248_v10, %v674_v55, %v1281_v63 }
 0x106   : > { %v443_v3 = vshll.u32 %v1128_v17, %v437_v38  ;;  %v444_v4 = vshrl.u32 %v1129_v19, %v438_v48  ;;  %v446_v5 = vshll.u32 %v1129_v19, %v437_v38  ;;  %v447_v6 = vshrl.u32 %v1130_v21, %v438_v48 }
 0x107   : > { %v449_v7 = vshll.u32 %v1130_v21, %v437_v38  ;;  %v450_v8 = vshrl.u32 %v1131_v23, %v438_v48  ;;  %v442_v9 = vor.u32 %v441_v2, %v440_v59  ;;  %v452_v14 = vshll.u32 %v1131_v23, %v437_v38 }
 0x108   : > { %v445_v12 = vor.u32 %v444_v4, %v443_v3  ;;  %v453_v10 = vshrl.u32 %v1132_v30, %v438_v48  ;;  %vm688_vm8 = vc.u32 %v1278_v62, %v1281_v63  ;;  %v689_v16 = vadd.s32 1, %v1282_v0 }
 0x109   : > { %v439_v18 = vshrl.u32 %v1127_v15, %v438_v48  ;;  %v448_v20 = vor.u32 %v447_v6, %v446_v5  ;;  %v451_v22 = vor.u32 %v450_v8, %v449_v7  ;;  %vm455_vm9 = vcmp.lt.s32.totalorder %v436_v58, 1 }
 0x10a   : > { %v454_v24 = vor.u32 %v453_v10, %v452_v14  ;;  %vm456_vm10 = vcmp.lt.s32.totalorder %v436_v58, 2  ;;  %v690_v25 = vsel %vm688_vm8, %v689_v16, %v1282_v0  ;;  %vm457_vm11 = vcmp.lt.s32.totalorder %v436_v58, 3 }
 0x10b   : > { %vm458_vm12 = vcmp.lt.s32.totalorder %v436_v58, 4  ;;  %v463_v26 = vsel %vm455_vm9, %v442_v9, %v445_v12  ;;  %v691_v27 = vadd.s32 %v690_v25, %v686_v1  ;;  %v467_v31 = vsel %vm455_vm9, %v445_v12, %v448_v20 }
 0x10c   : > { %v460_v28 = vsel %vm458_vm12, %v448_v20, 2102212464  ;;  %v464_v29 = vsel %vm458_vm12, %v451_v22, 920167782  ;;  %v459_v32 = vsel %vm455_vm9, %v439_v18, %v442_v9  ;;  %v468_v34 = vsel %vm458_vm12, %v454_v24, 1326507024 }
 0x10d   : > { %v465_v33 = vsel %vm457_vm11, %v448_v20, %v464_v29  ;;  %v692_v36 = vadd.s32 536870912, %v691_v27  ;;  %v461_v37 = vsel %vm457_vm11, %v445_v12, %v460_v28  ;;  %v469_v39 = vsel %vm457_vm11, %v451_v22, %v468_v34 }
 0x10e   : > { %v466_v38 = vsel %vm456_vm10, %v463_v26, %v465_v33  ;;  %v470_v41 = vsel %vm456_vm10, %v467_v31, %v469_v39  ;;  %v735_v44 = vand.u32 2147483647, %v1243_v61  ;;  %vm746_vm13 = vcmp.gt.s32.totalorder %v745_v35, 0 }
 0x10f   : > { %v1303_v42 = vmul.u32.u64.low %v1250_v11, %v466_v38  ;;  %v1304_v43 = vmul.u32.u64.high %v1250_v11, %v466_v38, %v1303_v42  ;;  %v1308_v45 = vshrl.u32 %v692_v36, 30  ;;  %v462_v50 = vsel %vm456_vm10, %v459_v32, %v461_v37 }
 0x110   : > { %v1311_v47 = vmul.u32.u64.low %v1250_v11, %v470_v41  ;;  %v1312_v48 = vmul.u32.u64.high %v1250_v11, %v470_v41, %v1311_v47  ;;  %v747_v51 = vsel %vm746_vm13, %v745_v35, 0  ;;  %v1318_v55 = vadd.f32 %v1228_v40, %v1252_v13 }
 0x111   : > { %v694_v53 = vshll.u32 %v1308_v45, 30  ;;  %v749_v54 = vand.u32 31, %v747_v51  ;;  %v481_v57 = vadd.s32 1, %v1304_v43  ;;  %v1323_v59 = vand.u32 8388607, %v735_v44 }
 0x112   : > { %v478_v0 = vmul.u32 %v1250_v11, %v462_v50  ;;  %vm480_vm14 = vc.u32 %v1312_v48, %v1303_v42  ;;  %v530_v40 = vand.u32 2139095040, %v1318_v55  ;;  %v687_v11 = vadd.s32 %v1281_v63, %v1278_v62 }
 0x113   : > { %v695_v60 = vsub.s32 %v691_v27, %v694_v53  ;;  %v482_v58 = vsel %vm480_vm14, %v481_v57, %v1304_v43  ;;  %v750_v1 = vsub.s32 32, %v749_v54  ;;  %v743_v13 = vor.u32 8388608, %v1323_v59 }
 0x114   : > { %v483_v3 = vadd.s32 %v482_v58, %v478_v0  ;;  %v748_v8 = vshrl.u32 %v747_v51, 5  ;;  %v758_v12 = vshll.u32 %v1129_v19, %v749_v54  ;;  %v752_v10 = vshll.u32 %v1127_v15, %v749_v54 }
 0x115   : > { %v697_v2 = vsub.s32 0, %v695_v60  ;;  %v753_v6 = vshrl.u32 %v1128_v17, %v750_v1  ;;  %v759_v7 = vshrl.u32 %v1130_v21, %v750_v1  ;;  %v756_v9 = vshrl.u32 %v1129_v19, %v750_v1 }
 0x116   : > { %v484_v5 = vadd.s32 536870912, %v483_v3  ;;  %v762_v16 = vshrl.u32 %v1131_v23, %v750_v1  ;;  %v531_v18 = vshrl.u32 %v530_v40, 23  ;;  %v717_v20 = vsub.s32 4, %v1308_v45 }
 0x117   : > { %v943_v4 = vmin.u32 %v697_v2, %v695_v60  ;;  %v755_v24 = vshll.u32 %v1128_v17, %v749_v54  ;;  %v760_v25 = vor.u32 %v759_v7, %v758_v12  ;;  %v754_v62 = vor.u32 %v753_v6, %v752_v10 }
 0x118   : > { %v1340_v22 = vshrl.u32 %v484_v5, 30  ;;  %v761_v63 = vshll.u32 %v1130_v21, %v749_v54  ;;  %v765_v27 = vshrl.u32 %v1132_v30, %v750_v1  ;;  %v764_v31 = vshll.u32 %v1131_v23, %v749_v54 }
 0x119   : > { %v699_v14 = vclz %v943_v4  ;;  %v757_v29 = vor.u32 %v756_v9, %v755_v24  ;;  %vm770_vm15 = vcmp.lt.s32.totalorder %v748_v8, 4  ;;  %v938_v34 = vadd.s32 4294967169, %v531_v18 }
 0x11a   : > { %v486_v28 = vshll.u32 %v1340_v22, 30  ;;  %v763_v32 = vor.u32 %v762_v16, %v761_v63  ;;  %v772_v33 = vsel %vm770_vm15, %v760_v25, 2102212464  ;;  %v751_v37 = vshrl.u32 %v1127_v15, %v750_v1 }
 0x11b   : > { %v944_v26 = vadd.s32 4294967294, %v699_v14  ;;  %v766_v38 = vor.u32 %v765_v27, %v764_v31  ;;  %vm767_vm1 = vcmp.lt.s32.totalorder %v748_v8, 1  ;;  %vm769_vm2 = vcmp.lt.s32.totalorder %v748_v8, 3 }
 0x11c   : > { %v1348_v36 = vsub.s32 %v483_v3, %v486_v28  ;;  %v771_v50 = vsel %vm767_vm1, %v751_v37, %v754_v62  ;;  %v773_v51 = vsel %vm769_vm2, %v757_v29, %v772_v33  ;;  %v775_v57 = vsel %vm767_vm1, %v754_v62, %v757_v29 }
 0x11d   : > { %vm945_vm0 = vcmp.lt.s32.totalorder %v944_v26, 0  ;;  %v776_v59 = vsel %vm770_vm15, %v763_v32, 920167782  ;;  %v779_v1 = vsel %vm767_vm1, %v757_v29, %v760_v25  ;;  %v780_v2 = vsel %vm770_vm15, %v766_v38, 1326507024 }
 0x11e   : > { %v702_v35 = vsel %vm945_vm0, 0, %v944_v26  ;;  %v489_v47 = vsub.s32 0, %v1348_v36  ;;  %v777_v58 = vsel %vm769_vm2, %v760_v25, %v776_v59  ;;  %vm768_vm3 = vcmp.lt.s32.totalorder %v748_v8, 2 }
 0x11f   : > { %v703_v39 = vsub.s32 32, %v702_v35  ;;  %v707_v41 = vsub.s32 4294967266, %v702_v35  ;;  %v704_v43 = vshll.u32 %v695_v60, %v702_v35  ;;  %v781_v60 = vsel %vm769_vm2, %v763_v32, %v780_v2 }
 0x120   : > { %v935_v0 = vmin.u32 %v489_v47, %v1348_v36  ;;  %vm633_vm4 = vcmp.lt.s32.totalorder %v1231_v46, 0  ;;  %v778_v5 = vsel %vm768_vm3, %v775_v57, %v777_v58  ;;  %v783_v6 = vshll.u32 %v743_v13, 8 }
 0x121   : > { %v705_v53 = vshrl.u32 %v687_v11, %v703_v39  ;;  %v708_v54 = vadd.s32 127, %v707_v41  ;;  %v718_v11 = vsel %vm633_vm4, %v717_v20, %v1308_v45  ;;  %v774_v9 = vsel %vm768_vm3, %v771_v50, %v773_v51 }
 0x122   : > { %v491_v4 = vclz %v935_v0  ;;  %v782_v12 = vsel %vm768_vm3, %v779_v1, %v781_v60  ;;  %v1365_v8 = vmul.u32.u64.low %v783_v6, %v778_v5  ;;  %v1366_v25 = vmul.u32.u64.high %v783_v6, %v778_v5, %v1365_v8 }
 0x123   : > { %v706_v3 = vor.u32 %v705_v53, %v704_v43  ;;  %v709_v40 = vshll.u32 %v708_v54, 23  ;;  %v1362_v16 = vmul.u32.u64.low %v783_v6, %v782_v12  ;;  %v1363_v18 = vmul.u32.u64.high %v783_v6, %v782_v12, %v1362_v16 }
 0x124   : > { %v936_v10 = vadd.s32 4294967294, %v491_v4  ;;  %v537_v26 = vadd.s32 1, %v938_v34  ;;  %vm1371_vm5 = vcmp.le.f32.partialorder %v631_v49, 0.7853982  ;;  %v527_v45 = vand.u32 2147483647, %v1318_v55 }
 0x125   : > { %v710_v7 = vor.u32 4788187, %v709_v40  ;;  %v713_v14 = vcvt.s32.f32 %v706_v3  ;;  %v479_v62 = vadd.s32 %v1303_v42, %v1312_v48  ;;  %v720_v27 = vsel %vm1371_vm5, 0, %v718_v11 }
 0x126   : > { %vm937_vm6 = vcmp.lt.s32.totalorder %v936_v10, 0  ;;  %vm538_vm7 = vcmp.gt.s32.totalorder %v537_v26, 0  ;;  %v790_v31 = vmul.u32 %v783_v6, %v774_v9  ;;  %vm792_vm8 = vc.u32 %v1363_v18, %v1365_v8 }
 0x127   : > { %v711_v24 = vand.u32 2147483647, %v710_v7  ;;  %v494_v63 = vsel %vm937_vm6, 0, %v936_v10  ;;  %v793_v49 = vadd.s32 1, %v1366_v25  ;;  %v539_v33 = vsel %vm538_vm7, %v537_v26, 0 }
 0x128   : > { %v495_v28 = vsub.s32 32, %v494_v63  ;;  %v499_v29 = vsub.s32 4294967266, %v494_v63  ;;  %v496_v34 = vshll.u32 %v1348_v36, %v494_v63  ;;  %v541_v42 = vand.u32 31, %v539_v33 }
 0x129   : > { %v714_v20 = vmul.f32 %v713_v14, %v711_v24  ;;  %v724_v38 = vadd.s32 3, %v720_v27  ;;  %v509_v39 = vsub.s32 4, %v1340_v22  ;;  %v794_v41 = vsel %vm792_vm8, %v793_v49, %v1366_v25 }
 0x12a   : > { %v497_v35 = vshrl.u32 %v479_v62, %v495_v28  ;;  %v500_v37 = vadd.s32 127, %v499_v29  ;;  %v795_v51 = vadd.s32 %v794_v41, %v790_v31  ;;  %vm425_vm9 = vcmp.lt.s32.totalorder %v1236_v52, 0 }
 0x12b   : > { %v715_v32 = vxor.u32 2147483648, %v714_v20  ;;  %v542_v36 = vsub.s32 32, %v541_v42  ;;  %vm1394_vm10 = vcmp.le.f32.partialorder %v423_v56, 0.7853982  ;;  %v1398_v59 = vand.u32 3, %v724_v38 }
 0x12c   : > { %v498_v47 = vor.u32 %v497_v35, %v496_v34  ;;  %v501_v50 = vshll.u32 %v500_v37, 23  ;;  %v796_v57 = vadd.s32 536870912, %v795_v51  ;;  %v1403_v58 = vsel %vm425_vm9, %v509_v39, %v1340_v22 }
 0x12d   : > { %v716_v48 = vsel %vm633_vm4, %v715_v32, %v714_v20  ;;  %v534_v1 = vand.u32 8388607, %v527_v45  ;;  %v545_v56 = vshrl.u32 %v1128_v17, %v542_v36  ;;  %v548_v40 = vshrl.u32 %v1129_v19, %v542_v36 }
 0x12e   : > { %v719_v43 = vsel %vm1371_vm5, %v1231_v46, %v716_v48  ;;  %v502_v54 = vor.u32 4788187, %v501_v50  ;;  %v505_v0 = vcvt.s32.f32 %v498_v47  ;;  %v1407_v3 = vshrl.u32 %v796_v57, 30 }
 0x12f   : > { %1049 = vcosq.f32 %v719_v43  ;;  %v1411_v60 = vshrl.u32 %v539_v33, 5  ;;  %v551_v4 = vshrl.u32 %v1130_v21, %v542_v36  ;;  %v553_v5 = vshll.u32 %v1130_v21, %v541_v42 }
 0x130   : > { %1051 = vsinq.f32 %v719_v43  ;;  %v503_v2 = vand.u32 2147483647, %v502_v54  ;;  %v554_v6 = vshrl.u32 %v1131_v23, %v542_v36  ;;  %v798_v7 = vshll.u32 %v1407_v3, 30 }
 0x131   : > { %v544_v11 = vshll.u32 %v1127_v15, %v541_v42  ;;  %v547_v9 = vshll.u32 %v1128_v17, %v541_v42  ;;  %v550_v12 = vshll.u32 %v1129_v19, %v541_v42  ;;  %v556_v10 = vshll.u32 %v1131_v23, %v541_v42 }
 0x132   : > { %v506_v22 = vmul.f32 %v505_v0, %v503_v2  ;;  %v555_v14 = vor.u32 %v554_v6, %v553_v5  ;;  %v557_v16 = vshrl.u32 %v1132_v30, %v542_v36  ;;  %v1422_v25 = vsub.s32 %v795_v51, %v798_v7 }
 0x133   : > { %v546_v21 = vor.u32 %v545_v56, %v544_v11  ;;  %v549_v26 = vor.u32 %v548_v40, %v547_v9  ;;  %vm727_vm11 = vcmp.eq.s32.totalorder %v1398_v59, 0  ;;  %vm730_vm12 = vcmp.eq.s32.totalorder %v1398_v59, 2 }
 0x134   : > { %v507_v24 = vxor.u32 2147483648, %v506_v22  ;;  %v552_v13 = vor.u32 %v551_v4, %v550_v12  ;;  %v558_v20 = vor.u32 %v557_v16, %v556_v10  ;;  %vm726_vm13 = vcmp.lt.s32.totalorder %v1398_v59, 2 }
 0x135   : > { %v512_v19 = vsel %vm1394_vm10, 0, %v1403_v58  ;;  %v801_v23 = vsub.s32 0, %v1422_v25  ;;  %vm562_vm14 = vcmp.lt.s32.totalorder %v1411_v60, 4  ;;  %vm723_vm15 = vweird.f32 %v1231_v46 }
 0x136   : > { %v508_v17 = vsel %vm425_vm9, %v507_v24, %v506_v22  ;;  %v535_v62 = vor.u32 8388608, %v534_v1  ;;  %vm559_vm0 = vcmp.lt.s32.totalorder %v1411_v60, 1  ;;  %v568_v63 = vsel %vm562_vm14, %v555_v14, 920167782 }
 0x137   : > { %v511_v30 = vsel %vm1394_vm10, %v1236_v52, %v508_v17  ;;  %v947_v27 = vmin.u32 %v801_v23, %v1422_v25  ;;  %vm561_vm1 = vcmp.lt.s32.totalorder %v1411_v60, 3  ;;  %v567_v28 = vsel %vm559_vm0, %v546_v21, %v549_v26 }
 0x138   : > { %1053 = vcosq.f32 %v511_v30  ;;  %v569_v29 = vsel %vm561_vm1, %v552_v13, %v568_v63  ;;  %v571_v31 = vsel %vm559_vm0, %v549_v26, %v552_v13  ;;  %v572_v32 = vsel %vm562_vm14, %v558_v20, 1326507024 }
 0x139   : > { %1055 = vsinq.f32 %v511_v30  ;;  %v803_v33 = vclz %v947_v27  ;;  %v543_v34 = vshrl.u32 %v1127_v15, %v542_v36  ;;  %vm560_vm2 = vcmp.lt.s32.totalorder %v1411_v60, 2 }
 0x13a   : > { %v564_v35 = vsel %vm562_vm14, %v552_v13, 2102212464  ;;  %v570_v48 = vsel %vm560_vm2, %v567_v28, %v569_v29  ;;  %v573_v38 = vsel %vm561_vm1, %v555_v14, %v572_v32  ;;  %v575_v39 = vshll.u32 %v535_v62, 8 }
 0x13b   : > { %v948_v43 = vadd.s32 4294967294, %v803_v33  ;;  %v563_v15 = vsel %vm559_vm0, %v543_v34, %v546_v21  ;;  %v574_v47 = vsel %vm560_vm2, %v571_v31, %v573_v38  ;;  %v565_v51 = vsel %vm561_vm1, %v549_v26, %v564_v35 }
 0x13c   : > { %v1050_v49 = vpop.eup %1049  ;;  %v1470_v36 = vmul.u32.u64.low %v575_v39, %v574_v47  ;;  %v1471_v53 = vmul.u32.u64.high %v575_v39, %v574_v47, %v1470_v36  ;;  %v1475_v57 = vmul.u32.u64.low %v575_v39, %v570_v48  ;;  %v1476_v0 = vmul.u32.u64.high %v575_v39, %v570_v48, %v1475_v57 }
 0x13d   : > { %v1052_v37 = vpop.eup %1051  ;;  %v731_v42 = vxor.u32 2147483648, %v1050_v49  ;;  %vm949_vm3 = vcmp.lt.s32.totalorder %v948_v43, 0  ;;  %v516_v1 = vadd.s32 3, %v512_v19  ;;  %v791_v2 = vadd.s32 %v1365_v8, %v1363_v18 }
 0x13e   : > { %v728_v41 = vxor.u32 2147483648, %v1052_v37  ;;  %v806_v56 = vsel %vm949_vm3, 0, %v948_v43  ;;  %v566_v6 = vsel %vm560_vm2, %v563_v15, %v565_v51  ;;  %vm584_vm4 = vc.u32 %v1471_v53, %v1475_v57 }
 0x13f   : > { %v732_v50 = vsel %vm730_vm12, %v731_v42, %v1052_v37  ;;  %v807_v4 = vsub.s32 32, %v806_v56  ;;  %v811_v5 = vsub.s32 4294967266, %v806_v56  ;;  %v808_v59 = vshll.u32 %v1422_v25, %v806_v56 }
 0x140   : > { %v729_v54 = vsel %vm727_vm11, %v1050_v49, %v728_v41  ;;  %v585_v18 = vadd.s32 1, %v1476_v0  ;;  %v517_v8 = vand.u32 3, %v516_v1  ;;  %v582_v46 = vmul.u32 %v575_v39, %v566_v6 }
 0x141   : > { %v733_v58 = vsel %vm726_vm13, %v729_v54, %v732_v50  ;;  %v809_v22 = vshrl.u32 %v791_v2, %v807_v4  ;;  %v812_v7 = vadd.s32 127, %v811_v5  ;;  %vm515_vm8 = vweird.f32 %v1236_v52 }
 0x142   : > { %v734_v40 = vsel %vm723_vm15, nan, %v733_v58  ;;  %v586_v12 = vsel %vm584_vm4, %v585_v18, %v1476_v0  ;;  %vm522_vm5 = vcmp.eq.s32.totalorder %v517_v8, 2  ;;  %vm519_vm6 = vcmp.eq.s32.totalorder %v517_v8, 0 }
 0x143   : > { %841 = vst [vmem:[%s1486_s14 + $0x10] sm:$0xff] %v734_v40  ;;  %v810_v11 = vor.u32 %v809_v22, %v808_v59  ;;  %v813_v9 = vshll.u32 %v812_v7, 23  ;;  %v587_v14 = vadd.s32 %v586_v12, %v582_v46  ;;  %vm518_vm7 = vcmp.lt.s32.totalorder %v517_v8, 2 }
 0x144   : > { %vm737_vm9 = vcmp.lt.s32.totalorder %v1243_v61, 0  ;;  %v821_v28 = vsub.s32 4, %v1407_v3  ;;  %vm736_vm10 = vcmp.le.f32.partialorder %v735_v44, 0.7853982  ;;  %v583_v38 = vadd.s32 %v1475_v57, %v1471_v53 }
 0x145   : > { %v1054_v60 = vpop.eup %1053  ;;  %v814_v24 = vor.u32 4788187, %v813_v9  ;;  %v588_v26 = vadd.s32 536870912, %v587_v14  ;;  %v817_v20 = vcvt.s32.f32 %v810_v11  ;;  %vm827_vm15 = vweird.f32 %v1243_v61 }
 0x146   : > { %v1056_v10 = vpop.eup %1055  ;;  %v523_v16 = vxor.u32 2147483648, %v1054_v60  ;;  %v822_v52 = vsel %vm737_vm9, %v821_v28, %v1407_v3  ;;  %vm529_vm0 = vcmp.lt.s32.totalorder %v1318_v55, 0  ;;  %vm528_vm1 = vcmp.le.f32.partialorder %v527_v45, 0.7853982 }
 0x147   : > { %v520_v21 = vxor.u32 2147483648, %v1056_v10  ;;  %v815_v13 = vand.u32 2147483647, %v814_v24  ;;  %v589_v19 = vshrl.u32 %v588_v26, 30  ;;  %v824_v35 = vsel %vm736_vm10, 0, %v822_v52 }
 0x148   : > { %v524_v25 = vsel %vm522_vm5, %v523_v16, %v1056_v10  ;;  %v828_v42 = vadd.s32 3, %v824_v35  ;;  %vm619_vm5 = vweird.f32 %v1318_v55 }
 0x149   : > { %v521_v17 = vsel %vm519_vm6, %v1054_v60, %v520_v21  ;;  %v818_v30 = vmul.f32 %v817_v20, %v815_v13  ;;  %v590_v63 = vshll.u32 %v589_v19, 30  ;;  %v613_v6 = vsub.s32 4, %v589_v19 }
 0x14a   : > { %v525_v23 = vsel %vm518_vm7, %v521_v17, %v524_v25  ;;  %v829_v44 = vand.u32 3, %v828_v42 }
 0x14b   : > { %v526_v62 = vsel %vm515_vm8, nan, %v525_v23  ;;  %v819_v27 = vxor.u32 2147483648, %v818_v30  ;;  %v591_v29 = vsub.s32 %v587_v14, %v590_v63  ;;  %v614_v7 = vsel %vm529_vm0, %v613_v6, %v589_v19 }
 0x14c   : > { %839 = vst [vmem:[%s1486_s14] sm:$0xff] %v526_v62  ;;  %vm834_vm12 = vcmp.eq.s32.totalorder %v829_v44, 2  ;;  %vm831_vm13 = vcmp.eq.s32.totalorder %v829_v44, 0  ;;  %vm830_vm14 = vcmp.lt.s32.totalorder %v829_v44, 2 }
 0x14d   : > { %v820_v31 = vsel %vm737_vm9, %v819_v27, %v818_v30  ;;  %v593_v49 = vsub.s32 0, %v591_v29 }
 0x14e   : > { %v823_v32 = vsel %vm736_vm10, %v1243_v61, %v820_v31  ;;  %v616_v61 = vsel %vm528_vm1, 0, %v614_v7 }
 0x14f   : > { %1057 = vcosq.f32 %v823_v32  ;;  %v939_v33 = vmin.u32 %v593_v49, %v591_v29  ;;  %v620_v18 = vadd.s32 3, %v616_v61 }
 0x150   : > { %1059 = vsinq.f32 %v823_v32 }
 0x151   : > { %v595_v34 = vclz %v939_v33  ;;  %v621_v8 = vand.u32 3, %v620_v18 }
 0x153   : > { %v940_v37 = vadd.s32 4294967294, %v595_v34  ;;  %vm626_vm2 = vcmp.eq.s32.totalorder %v621_v8, 2  ;;  %vm623_vm3 = vcmp.eq.s32.totalorder %v621_v8, 0  ;;  %vm622_vm4 = vcmp.lt.s32.totalorder %v621_v8, 2 }
 0x155   : > { %vm941_vm11 = vcmp.lt.s32.totalorder %v940_v37, 0 }
 0x156   : > { %v598_v48 = vsel %vm941_vm11, 0, %v940_v37 }
 0x157   : > { %v599_v39 = vsub.s32 32, %v598_v48  ;;  %v603_v41 = vsub.s32 4294967266, %v598_v48  ;;  %v600_v43 = vshll.u32 %v591_v29, %v598_v48 }
 0x159   : > { %v601_v15 = vshrl.u32 %v583_v38, %v599_v39  ;;  %v604_v47 = vadd.s32 127, %v603_v41 }
 0x15b   : > { %v602_v51 = vor.u32 %v601_v15, %v600_v43  ;;  %v605_v36 = vshll.u32 %v604_v47, 23 }
 0x15c   : > { %v1058_v50 = vpop.eup %1057 }
 0x15d   : > { %v1060_v3 = vpop.eup %1059  ;;  %v835_v54 = vxor.u32 2147483648, %v1058_v50  ;;  %v606_v58 = vor.u32 4788187, %v605_v36  ;;  %v609_v57 = vcvt.s32.f32 %v602_v51 }
 0x15e   : > { %v832_v0 = vxor.u32 2147483648, %v1060_v3 }
 0x15f   : > { %v836_v1 = vsel %vm834_vm12, %v835_v54, %v1060_v3  ;;  %v607_v53 = vand.u32 2147483647, %v606_v58 }
 0x160   : > { %v833_v2 = vsel %vm831_vm13, %v1058_v50, %v832_v0 }
 0x161   : > { %v837_v56 = vsel %vm830_vm14, %v833_v2, %v836_v1  ;;  %v610_v4 = vmul.f32 %v609_v57, %v607_v53 }
 0x162   : > { %v838_v40 = vsel %vm827_vm15, nan, %v837_v56 }
 0x163   : > { %842 = vst [vmem:[%s1486_s14 + $0x18] sm:$0xff] %v838_v40  ;;  %v611_v5 = vxor.u32 2147483648, %v610_v4 }
 0x165   : > { %v612_v59 = vsel %vm529_vm0, %v611_v5, %v610_v4 }
 0x166   : > { %v615_v22 = vsel %vm528_vm1, %v1318_v55, %v612_v59 }
 0x167   : > { %1061 = vcosq.f32 %v615_v22 }
 0x168   : > { %1063 = vsinq.f32 %v615_v22 }
 0x174   : > { %v1062_v46 = vpop.eup %1061 }
 0x175   : > { %v1064_v11 = vpop.eup %1063  ;;  %v627_v9 = vxor.u32 2147483648, %v1062_v46 }
 0x176   : > { %v624_v12 = vxor.u32 2147483648, %v1064_v11 }
 0x177   : > { %v628_v45 = vsel %vm626_vm2, %v627_v9, %v1064_v11 }
 0x178   : > { %v625_v60 = vsel %vm623_vm3, %v1062_v46, %v624_v12 }
 0x179   : > { %v629_v14 = vsel %vm622_vm4, %v625_v60, %v628_v45 }
 0x17a   : > { %v630_v10 = vsel %vm619_vm5, nan, %v629_v14 }
 0x17b   : > { %840 = vst [vmem:[%s1486_s14 + $0x8] sm:$0xff] %v630_v10 }
 0x17c   : > { %1078 = shalt.err (!%p1075_p3)
}
 0x17d   : > { %s1079_s7 = scalar_lea.hbm %s1513_s28, 512  ;;  %s1083_s10 = scalar_lea.hbm %s1565_s4, 1024 }
 0x17e   : > { %p1080_p4 = scmp.ne.s32.totalorder %s1513_s28, %s1079_s7  ;;  %p1084_p9 = scmp.lt.s32.totalorder %s1513_s28, %s1565_s4 }
 0x17f   : > { %p1085_p10 = scmp.lt.s32.totalorder %s1083_s10, %s1079_s7 }
 0x180   : > { %p1081_p7 = pnand %p1080_p4, %p1199_p5 }
 0x181   : > { %p1086_p11 = por %p1085_p10, %p1084_p9 }
 0x182   : > { %p1082_p8 = pneg %p1081_p7 }
 0x184   : > { %p1087_p12 = pnand %p1086_p11, %p1082_p8 }
 0x186   : > { %1090 = shalt.err (!%p1087_p12)
}
 0x187   : > { %s1134_s13 = smov 128   ;;  %s1135_s14 = smov 8  }
 0x188   : > { %1002 = dma.vmem_to_hbm [thread:$0]  (%p1199_p5), %s1515_s22, 512, %s1513_s28, %s1521_s19, %s1134_s13, %s1134_s13, %s1135_s14  }
 0x189 PF: > { %p1008_p13 = scmp.ge.s32.totalorder %s1125_s18, 2  ;;  %s872_s20 = sand.u32 1, %s1113_s15  }
 0x18a   : > { %s873_s23 = scalar_lea.sflag [#allocation3], %s872_s20 }
 0x18b   : > { %p1005_p0 = pnand %p1008_p13, %p1203_p6 }
 0x18d   : > { %p1006_p1 = pneg %p1005_p0 }
 0x18f   : > { %1108 = dma.done.wait (%p1006_p1), %s873_s23, 512  }
 0x190   : > { %1110 = vsyncadd (%p1006_p1), %s873_s23, 4294966784  ;;  %p14_p2 = scmp.ge.s32.totalorder %s1186_s21, 4   ;;  %s1572_s15 = smov %s1117_s16 }
 0x191   : > { %s1573_s16 = smov %s1121_s17  ;;  %s1574_s17 = smov %s1197_s24 }
 0x192   : > { %s1575_s18 = smov %s1186_s21  ;;  %16 = sbr.rel (!%p14_p2) target bundleno = 3 (0x3), region = 71 }
 0x197   :  { %878 = vsyncpa [#allocation3], 1 }
 0x198   :  { %880 = vsyncpa [#allocation3 + $0x1], 1 }

</bundles_post_ra>
